<compile_context>
chip_gen: v7x
topology: tpu7x:2x2x1
jax: 0.10.0
libtpu: 0.0.40
codegen_flags: <defaults>
</compile_context>

<pallas_src>
import jax
import jax.numpy as jnp
from jax.experimental import pallas as pl
from jax.experimental.pallas import tpu as pltpu

# Scaled-down shapes consistent with the module structure
# (module uses 224x224 spatial; everything else is identical).
B = 2
CIN = 3
COUT = 64
H = W = 16
HW = H * W
K_RAW = 9 * CIN          # 27 = 3*3*CIN contraction length
K_BIAS = K_RAW           # padded row carrying the conv bias (ones column in xcol)
K_PAD = 32               # zero-pad contraction dim to a sublane-friendly size


def _is_dual_tensorcore_chip() -> bool:
    # v7x has 2 TensorCores/chip -> keep the batch axis parallel on the grid.
    # Single-TC v5e/v6e -> fold the batch into one grid step instead.
    try:
        kind = jax.devices()[0].device_kind.lower()
    except Exception:
        return False
    return "7" in kind


def make_kernel(bpg: int):
    def kernel(xcol_ref, wc_ref, wf_ref, bf_ref, out_ref):
        # xcol_ref: (bpg*HW, K_PAD) bf16  im2col patches (+ ones column at K_BIAS)
        # wc_ref:   (K_PAD, COUT)   bf16  conv weight (dh,dw,cin) order, bias at row K_BIAS
        # wf_ref:   (HW, COUT)      f32   fc weight permuted to NHWC-flatten order
        # bf_ref:   (1, 1)          f32   fc bias
        # out_ref:  (1, bpg, 128)   f32   per-batch scalar broadcast over lanes
        #
        # One MXU matmul computes conv + conv-bias (bias folded via the ones column).
        acc = jnp.dot(xcol_ref[...], wc_ref[...],
                      preferred_element_type=jnp.float32)        # (bpg*HW, COUT) f32
        relu = jnp.maximum(acc, 0.0)                              # VPU
        # Dropout(p=0.5) == identity in eval-mode forward.
        for b in range(bpg):                                      # static, bpg <= 2
            prod = relu[b * HW:(b + 1) * HW, :] * wf_ref[...]     # VPU (f32)
            s = jnp.sum(prod, axis=0, keepdims=True)              # (1, COUT)  XLU
            s = jnp.sum(s, axis=1, keepdims=True)                 # (1, 1)     XLU
            val = s + bf_ref[...]
            out_ref[:, b:b + 1, :] = jnp.broadcast_to(val.reshape(1, 1, 1),
                                                      (1, 1, 128))
    return kernel


def calisthenics_forward(x_nchw, w_conv_oihw, b_conv, w_fc, b_fc):
    # ---- glue: layout plumbing only, all compute stays in the kernel ----
    x_nhwc = jnp.transpose(x_nchw, (0, 2, 3, 1)).astype(jnp.float32)
    x_pad = jnp.pad(x_nhwc, ((0, 0), (1, 1), (1, 1), (0, 0)))
    # im2col: tap order (dh, dw, cin), matching the weight reshape below.
    taps = [x_pad[:, dh:dh + H, dw:dw + W, :] for dh in range(3) for dw in range(3)]
    xcol = jnp.concatenate(taps, axis=-1).reshape(B * HW, K_RAW)
    xcol = jnp.pad(xcol, ((0, 0), (0, K_PAD - K_RAW)))
    # ones column drives the conv-bias row of wc (exact in bf16).
    xcol = xcol.at[:, K_BIAS].set(1.0).astype(jnp.bfloat16)

    # OIHW -> HWIO -> (dh*3*CIN + dw*CIN + cin, cout); conv bias in row K_BIAS.
    wc = jnp.transpose(w_conv_oihw, (2, 3, 1, 0)).reshape(K_RAW, COUT)
    wc = jnp.pad(wc, ((0, K_PAD - K_RAW), (0, 0)))
    wc = wc.at[K_BIAS, :].set(b_conv.reshape(COUT)).astype(jnp.bfloat16)

    # torch flatten index = c*H*W + h*W + w  ->  wf[h*W + w, c]
    wf = jnp.transpose(w_fc.reshape(COUT, HW), (1, 0)).astype(jnp.float32)
    bf = b_fc.reshape(1, 1).astype(jnp.float32)

    bpg = 1 if _is_dual_tensorcore_chip() else B     # batches per grid step
    n_steps = B // bpg

    out = pl.pallas_call(
        make_kernel(bpg),
        out_shape=jax.ShapeDtypeStruct((n_steps, bpg, 128), jnp.float32),
        grid_spec=pltpu.PrefetchScalarGridSpec(
            num_scalar_prefetch=0,
            grid=(n_steps,),
            in_specs=[
                pl.BlockSpec((bpg * HW, K_PAD), lambda i: (i, 0)),
                pl.BlockSpec((K_PAD, COUT), lambda i: (0, 0)),
                pl.BlockSpec((HW, COUT), lambda i: (0, 0)),
                pl.BlockSpec((1, 1), lambda i: (0, 0)),
            ],
            out_specs=pl.BlockSpec((1, bpg, 128), lambda i: (i, 0, 0)),
        ),
        compiler_params=pltpu.CompilerParams(
            dimension_semantics=("parallel",)),
    )(xcol, wc, wf, bf)
    # each batch element's scalar lives at [step, b, 0]
    return out.reshape(B, 128)[:, :1]


def reference_forward(x_nchw, w_conv_oihw, b_conv, w_fc, b_fc):
    # pure-JAX f32 reference reproducing the PyTorch forward (NCHW, eval-mode dropout)
    y = jax.lax.conv_general_dilated(
        x_nchw, w_conv_oihw, window_strides=(1, 1),
        padding=((1, 1), (1, 1)),
        dimension_numbers=("NCHW", "OIHW", "NCHW"))
    y = jax.nn.relu(y + b_conv.reshape(1, COUT, 1, 1))
    flat = y.reshape(B, -1)
    return flat @ w_fc.T + b_fc


if __name__ == "__main__":
    key = jax.random.PRNGKey(0)
    kx, kwc, kbc, kwf, kbf = jax.random.split(key, 5)

    # deterministic "synthetic checkpoint"
    x = jax.random.normal(kx, (B, CIN, H, W), jnp.float32)
    w_conv = jax.random.normal(kwc, (COUT, CIN, 3, 3), jnp.float32) * 0.1
    b_conv = jax.random.normal(kbc, (COUT,), jnp.float32) * 0.1
    w_fc = jax.random.normal(kwf, (1, COUT * H * W), jnp.float32) * (1.0 / (COUT * HW) ** 0.5)
    b_fc = jax.random.normal(kbf, (1,), jnp.float32) * 0.1

    out = calisthenics_forward(x, w_conv, b_conv, w_fc, b_fc)
    out = jax.block_until_ready(out)

    ref = reference_forward(x, w_conv, b_conv, w_fc, b_fc)
    assert out.shape == (B, 1), out.shape
    # bf16 conv-matmul operands (f32 accumulation) vs the pure-f32 reference:
    # tolerance loosened slightly per the mixed-precision path.
    assert jnp.allclose(out, ref, rtol=5e-3, atol=5e-3), (out, ref)

    print("KERNEL_OK")
</pallas_src>

<mosaic_0001>
module attributes {stable_mosaic.version = 11 : i64} {
  func.func @kernel(%arg0: i32, %arg1: memref<512x32xbf16, #tpu.memory_space<vmem>>, %arg2: memref<32x64xbf16, #tpu.memory_space<vmem>>, %arg3: memref<256x64xf32, #tpu.memory_space<vmem>>, %arg4: memref<1x1xf32, #tpu.memory_space<vmem>>, %arg5: memref<1x2x128xf32, #tpu.memory_space<vmem>>) attributes {dimension_semantics = [#tpu.dimension_semantics<parallel>], iteration_bounds = array<i64: 1>, scalar_prefetch = 0 : i64, scratch_operands = 0 : i64, tpu.core_type = #tpu.core_type<tc>, window_params = [{transform_indices = @transform_0, window_bounds = array<i64: 512, 32>}, {pipeline_mode = #tpu.pipeline_mode<synchronous>, transform_indices = @transform_1, window_bounds = array<i64: 32, 64>}, {pipeline_mode = #tpu.pipeline_mode<synchronous>, transform_indices = @transform_2, window_bounds = array<i64: 256, 64>}, {pipeline_mode = #tpu.pipeline_mode<synchronous>, transform_indices = @transform_3, window_bounds = array<i64: 1, 1>}, {transform_indices = @transform_4, window_bounds = array<i64: 1, 2, 128>}]} {
    %c0 = arith.constant 0 : index
    %c0_0 = arith.constant 0 : index
    %0 = vector.load %arg1[%c0, %c0_0] : memref<512x32xbf16, #tpu.memory_space<vmem>>, vector<512x32xbf16>
    %c0_1 = arith.constant 0 : index
    %c0_2 = arith.constant 0 : index
    %1 = vector.load %arg2[%c0_1, %c0_2] : memref<32x64xbf16, #tpu.memory_space<vmem>>, vector<32x64xbf16>
    %cst = arith.constant dense<0.000000e+00> : vector<512x64xf32>
    %2 = tpu.matmul %0, %1, %cst {dimension_numbers = #tpu.dot_dimension_numbers<[1], [0], [0], [1], [0, 0, 1, 1], [], []>} : vector<512x32xbf16>, vector<32x64xbf16>, vector<512x64xf32> -> vector<512x64xf32>
    %cst_3 = arith.constant 0.000000e+00 : f32
    %3 = vector.broadcast %cst_3 : f32 to vector<512x64xf32>
    %4 = arith.maximumf %2, %3 : vector<512x64xf32>
    %5 = vector.extract_strided_slice %4 {offsets = [0, 0], sizes = [256, 64], strides = [1, 1]} : vector<512x64xf32> to vector<256x64xf32>
    %c0_4 = arith.constant 0 : index
    %c0_5 = arith.constant 0 : index
    %6 = vector.load %arg3[%c0_4, %c0_5] : memref<256x64xf32, #tpu.memory_space<vmem>>, vector<256x64xf32>
    %7 = arith.mulf %5, %6 : vector<256x64xf32>
    %cst_6 = arith.constant dense<0.000000e+00> : vector<64xf32>
    %8 = vector.multi_reduction <add>, %7, %cst_6 [0] : vector<256x64xf32> to vector<64xf32>
    %9 = vector.shape_cast %8 : vector<64xf32> to vector<1x64xf32>
    %cst_7 = arith.constant dense<0.000000e+00> : vector<1xf32>
    %10 = vector.multi_reduction <add>, %9, %cst_7 [1] : vector<1x64xf32> to vector<1xf32>
    %11 = vector.shape_cast %10 : vector<1xf32> to vector<1x1xf32>
    %c0_8 = arith.constant 0 : index
    %c0_9 = arith.constant 0 : index
    %12 = vector.load %arg4[%c0_8, %c0_9] : memref<1x1xf32, #tpu.memory_space<vmem>>, vector<1x1xf32>
    %13 = arith.addf %11, %12 : vector<1x1xf32>
    %14 = vector.shape_cast %13 : vector<1x1xf32> to vector<1x1x1xf32>
    %15 = vector.shape_cast %14 : vector<1x1x1xf32> to vector<1x1x1xf32>
    %16 = vector.broadcast %15 : vector<1x1x1xf32> to vector<1x1x128xf32>
    %c0_10 = arith.constant 0 : index
    %c0_11 = arith.constant 0 : index
    %c0_12 = arith.constant 0 : index
    %17 = vector.load %arg5[%c0_10, %c0_11, %c0_12] : memref<1x2x128xf32, #tpu.memory_space<vmem>>, vector<1x1x128xf32>
    tpu.vector_store %arg5[%c0_10, %c0_11, %c0_12], %16 {strides = array<i32>} : memref<1x2x128xf32, #tpu.memory_space<vmem>>, vector<1x1x128xf32>,
    %18 = vector.extract_strided_slice %4 {offsets = [256, 0], sizes = [256, 64], strides = [1, 1]} : vector<512x64xf32> to vector<256x64xf32>
    %c0_13 = arith.constant 0 : index
    %c0_14 = arith.constant 0 : index
    %19 = vector.load %arg3[%c0_13, %c0_14] : memref<256x64xf32, #tpu.memory_space<vmem>>, vector<256x64xf32>
    %20 = arith.mulf %18, %19 : vector<256x64xf32>
    %cst_15 = arith.constant dense<0.000000e+00> : vector<64xf32>
    %21 = vector.multi_reduction <add>, %20, %cst_15 [0] : vector<256x64xf32> to vector<64xf32>
    %22 = vector.shape_cast %21 : vector<64xf32> to vector<1x64xf32>
    %cst_16 = arith.constant dense<0.000000e+00> : vector<1xf32>
    %23 = vector.multi_reduction <add>, %22, %cst_16 [1] : vector<1x64xf32> to vector<1xf32>
    %24 = vector.shape_cast %23 : vector<1xf32> to vector<1x1xf32>
    %c0_17 = arith.constant 0 : index
    %c0_18 = arith.constant 0 : index
    %25 = vector.load %arg4[%c0_17, %c0_18] : memref<1x1xf32, #tpu.memory_space<vmem>>, vector<1x1xf32>
    %26 = arith.addf %24, %25 : vector<1x1xf32>
    %27 = vector.shape_cast %26 : vector<1x1xf32> to vector<1x1x1xf32>
    %28 = vector.shape_cast %27 : vector<1x1x1xf32> to vector<1x1x1xf32>
    %29 = vector.broadcast %28 : vector<1x1x1xf32> to vector<1x1x128xf32>
    %c0_19 = arith.constant 0 : index
    %c1 = arith.constant 1 : index
    %c0_20 = arith.constant 0 : index
    %30 = vector.load %arg5[%c0_19, %c1, %c0_20] : memref<1x2x128xf32, #tpu.memory_space<vmem>>, vector<1x1x128xf32>
    tpu.vector_store %arg5[%c0_19, %c1, %c0_20], %29 {strides = array<i32>} : memref<1x2x128xf32, #tpu.memory_space<vmem>>, vector<1x1x128xf32>,
    return
  }
  func.func @transform_0(%arg0: i32) -> (i32, i32) {
    %c0_i32 = arith.constant 0 : i32
    %c0_i32_0 = arith.constant 0 : i32
    return %arg0, %c0_i32 : i32, i32
  }
  func.func @transform_1(%arg0: i32) -> (i32, i32) {
    %c0_i32 = arith.constant 0 : i32
    %c0_i32_0 = arith.constant 0 : i32
    %c0_i32_1 = arith.constant 0 : i32
    return %c0_i32, %c0_i32_0 : i32, i32
  }
  func.func @transform_2(%arg0: i32) -> (i32, i32) {
    %c0_i32 = arith.constant 0 : i32
    %c0_i32_0 = arith.constant 0 : i32
    %c0_i32_1 = arith.constant 0 : i32
    return %c0_i32, %c0_i32_0 : i32, i32
  }
  func.func @transform_3(%arg0: i32) -> (i32, i32) {
    %c0_i32 = arith.constant 0 : i32
    %c0_i32_0 = arith.constant 0 : i32
    %c0_i32_1 = arith.constant 0 : i32
    return %c0_i32, %c0_i32_0 : i32, i32
  }
  func.func @transform_4(%arg0: i32) -> (i32, i32, i32) {
    %c0_i32 = arith.constant 0 : i32
    %c0_i32_0 = arith.constant 0 : i32
    %c0_i32_1 = arith.constant 0 : i32
    return %arg0, %c0_i32, %c0_i32_0 : i32, i32, i32
  }
}

</mosaic_0001>

<bundles_post_ra>
// kernel: tpu_custom_call.1
= control target key start
LH: loop header
LB: loop body
LE: loop exit
PB: predicated region body
PF: predicated region fallthrough
CT: control target
= control target key end

     0   :  { %s1594_s0 = inlined_call_operand.vmem [shape: bf16[512,32], index: 0, kind: input, shape index: {}]   ;;  %s1595_s1 = inlined_call_operand.vmem [shape: bf16[32,64], index: 1, kind: input, shape index: {}]   ;;  %s1596_s2 = inlined_call_operand.vmem [shape: f32[256,64], index: 2, kind: input, shape index: {}]   ;;  %s1597_s3 = inlined_call_operand.<no memory space> [shape: f32[1,1], index: 3, kind: input, shape index: {}]   ;;  %s1598_s4 = inlined_call_operand.hbm [shape: f32[1,2,128], index: 4, kind: output, shape index: {}]  }
   0x1   :  { %v9_v0 = vstv %s1597_s3 }
   0x2   :  { %10 = vst [vmem:[#allocation2] sm:$0x1] %v9_v0 }
   0x3   :  { %v1198_v1 = vld [vmem:[%s1595_s1] sm:$0xff]   ;;  %v1199_v2 = vld [vmem:[%s1595_s1 + $0x8] sm:$0xff]   ;;  %vm261_vm0 = vcmask 261120   ;;  %v1204_v7 = vld [vmem:[%s1594_s0 + $0x10] sm:$0xff]  }
   0x4   :  { %1122 = vmatprep.subr.bf16.mxu0 %v1198_v1  ;;  %1190 = vmatprep.subr.bf16.mxu1 %v1198_v1  ;;  %v1200_v3 = vld [vmem:[%s1594_s0] sm:$0xff]   ;;  %v1202_v5 = vld [vmem:[%s1594_s0 + $0x8] sm:$0xff]   ;;  %v1205_v8 = vld [vmem:[%s1594_s0 + $0x90] sm:$0xff]  }
   0x5   :  { %1123 = vmatpush3.bf16.msra.mxu0 %v1198_v1  ;;  %1192 = vmatpush3.bf16.msra.mxu1 %v1198_v1  ;;  %v1201_v4 = vld [vmem:[%s1594_s0 + $0x80] sm:$0xff]   ;;  %v1203_v6 = vld [vmem:[%s1594_s0 + $0x88] sm:$0xff]   ;;  %v1206_v9 = vld [vmem:[%s1594_s0 + $0x18] sm:$0xff]  }
   0x6   :  { %1124 = vmatprep.subr.bf16.mxu0 %v1199_v2  ;;  %1191 = vmatprep.subr.bf16.mxu1 %v1199_v2  ;;  %v1207_v10 = vld [vmem:[%s1594_s0 + $0x98] sm:$0xff]   ;;  %v1208_v11 = vld [vmem:[%s1594_s0 + $0x20] sm:$0xff]   ;;  %v1210_v13 = vld [vmem:[%s1594_s0 + $0x28] sm:$0xff]  }
   0x7   :  { %1126 = vmatprep.mubr.msk.bf16.mxu0 %vm261_vm0, %v1200_v3  ;;  %1158 = vmatprep.mubr.msk.bf16.mxu1 %vm261_vm0, %v1201_v4  ;;  %v1209_v12 = vld [vmem:[%s1594_s0 + $0xa0] sm:$0xff]   ;;  %v1211_v14 = vld [vmem:[%s1594_s0 + $0xa8] sm:$0xff]   ;;  %v1212_v15 = vld [vmem:[%s1594_s0 + $0x30] sm:$0xff]  }
   0x8   :  { %v1213_v16 = vld [vmem:[%s1594_s0 + $0xb0] sm:$0xff]   ;;  %v1214_v17 = vld [vmem:[%s1594_s0 + $0x38] sm:$0xff]   ;;  %v1216_v19 = vld [vmem:[%s1594_s0 + $0x40] sm:$0xff]  }
   0x9   :  { %1125 = vmatpush3.bf16.msra.mxu0 %v1199_v2  ;;  %1193 = vmatpush3.bf16.msra.mxu1 %v1199_v2  ;;  %v1215_v18 = vld [vmem:[%s1594_s0 + $0xb8] sm:$0xff]   ;;  %v1217_v20 = vld [vmem:[%s1594_s0 + $0xc0] sm:$0xff]  }
   0xc   :  { %1127 = vmatmul.mubr.msk.bf16.vlgmr.msra.gmra.mrb[0].mxu0 %vm261_vm0, %v1202_v5  ;;  %1159 = vmatmul.mubr.msk.bf16.vlgmr.msra.gmra.mrb[0].mxu1 %vm261_vm0, %v1203_v6 }
   0xd   :  { %1130 = vmatprep.mubr.msk.bf16.mxu0 %vm261_vm0, %v1204_v7  ;;  %1162 = vmatprep.mubr.msk.bf16.mxu1 %vm261_vm0, %v1205_v8 }
  0x14   :  { %1131 = vmatmul.mubr.msk.bf16.gmra.mrb[4].mxu0 %vm261_vm0, %v1206_v9  ;;  %1163 = vmatmul.mubr.msk.bf16.gmra.mrb[4].mxu1 %vm261_vm0, %v1207_v10 }
  0x15   :  { %1134 = vmatprep.mubr.msk.bf16.mxu0 %vm261_vm0, %v1208_v11  ;;  %1166 = vmatprep.mubr.msk.bf16.mxu1 %vm261_vm0, %v1209_v12 }
  0x1c   :  { %1135 = vmatmul.mubr.msk.bf16.gmra.mrb[8].mxu0 %vm261_vm0, %v1210_v13  ;;  %1167 = vmatmul.mubr.msk.bf16.gmra.mrb[8].mxu1 %vm261_vm0, %v1211_v14 }
  0x1d   :  { %1138 = vmatprep.mubr.msk.bf16.mxu0 %vm261_vm0, %v1212_v15  ;;  %1170 = vmatprep.mubr.msk.bf16.mxu1 %vm261_vm0, %v1213_v16 }
  0x24   :  { %1139 = vmatmul.mubr.msk.bf16.gmra.mrb[12].mxu0 %vm261_vm0, %v1214_v17  ;;  %1171 = vmatmul.mubr.msk.bf16.gmra.mrb[12].mxu1 %vm261_vm0, %v1215_v18 }
  0x25   :  { %11 = vsyncpa [#allocation4], 0  ;;  %1142 = vmatprep.mubr.msk.bf16.mxu0 %vm261_vm0, %v1216_v19  ;;  %1174 = vmatprep.mubr.msk.bf16.mxu1 %vm261_vm0, %v1217_v20  ;;  %v1218_v21 = vld [vmem:[%s1594_s0 + $0x48] sm:$0xff]   ;;  %v1220_v23 = vld [vmem:[%s1594_s0 + $0x50] sm:$0xff]   ;;  %vm775_vm1 = vcmask 523264  }
  0x26   :  { %v1219_v22 = vld [vmem:[%s1594_s0 + $0xc8] sm:$0xff]   ;;  %v1221_v24 = vld [vmem:[%s1594_s0 + $0xd0] sm:$0xff]   ;;  %v1222_v25 = vld [vmem:[%s1594_s0 + $0x58] sm:$0xff]  }
  0x27   :  { %v1223_v26 = vld [vmem:[%s1594_s0 + $0xd8] sm:$0xff]   ;;  %v1224_v27 = vld [vmem:[%s1594_s0 + $0x60] sm:$0xff]   ;;  %v1226_v29 = vld [vmem:[%s1594_s0 + $0x68] sm:$0xff]  }
  0x28   :  { %v1225_v28 = vld [vmem:[%s1594_s0 + $0xe0] sm:$0xff]   ;;  %v1227_v30 = vld [vmem:[%s1594_s0 + $0xe8] sm:$0xff]   ;;  %v1228_v31 = vld [vmem:[%s1594_s0 + $0x70] sm:$0xff]  }
  0x29   :  { %v1229_v32 = vld [vmem:[%s1594_s0 + $0xf0] sm:$0xff]   ;;  %v1230_v33 = vld [vmem:[%s1594_s0 + $0x78] sm:$0xff]   ;;  %v711_v39 = vld [vmem:[%s1596_s2] sm:$0xff] }
  0x2a   :  { %v1231_v34 = vld [vmem:[%s1594_s0 + $0xf8] sm:$0xff]   ;;  %v713_v42 = vld [vmem:[%s1596_s2 + $0x10] sm:$0xff]  ;;  %v712_v51 = vld [vmem:[%s1596_s2 + $0x8] sm:$0xff] }
  0x2b   :  { %v714_v55 = vld [vmem:[%s1596_s2 + $0x18] sm:$0xff]  ;;  %v715_v10 = vld [vmem:[%s1596_s2 + $0x20] sm:$0xff] }
  0x2c   :  { %1143 = vmatmul.mubr.msk.bf16.gmra.mrb[16].mxu0 %vm261_vm0, %v1218_v21  ;;  %1175 = vmatmul.mubr.msk.bf16.gmra.mrb[16].mxu1 %vm261_vm0, %v1219_v22 }
  0x2d   :  { %1146 = vmatprep.mubr.msk.bf16.mxu0 %vm261_vm0, %v1220_v23  ;;  %1178 = vmatprep.mubr.msk.bf16.mxu1 %vm261_vm0, %v1221_v24  ;;  %v717_v24 = vld [vmem:[%s1596_s2 + $0x30] sm:$0xff] }
  0x34   :  { %1147 = vmatmul.mubr.msk.bf16.gmra.mrb[20].mxu0 %vm261_vm0, %v1222_v25  ;;  %1179 = vmatmul.mubr.msk.bf16.gmra.mrb[20].mxu1 %vm261_vm0, %v1223_v26 }
  0x35   :  { %1150 = vmatprep.mubr.msk.bf16.mxu0 %vm261_vm0, %v1224_v27  ;;  %1182 = vmatprep.mubr.msk.bf16.mxu1 %vm261_vm0, %v1225_v28 }
  0x3c   :  { %1151 = vmatmul.mubr.msk.bf16.gmra.mrb[24].mxu0 %vm261_vm0, %v1226_v29  ;;  %1183 = vmatmul.mubr.msk.bf16.gmra.mrb[24].mxu1 %vm261_vm0, %v1227_v30 }
  0x3d   :  { %1154 = vmatprep.mubr.msk.bf16.mxu0 %vm261_vm0, %v1228_v31  ;;  %1186 = vmatprep.mubr.msk.bf16.mxu1 %vm261_vm0, %v1229_v32 }
  0x44   :  { %1155 = vmatmul.mubr.msk.bf16.gmra.mrb[28].mxu0 %vm261_vm0, %v1230_v33  ;;  %1187 = vmatmul.mubr.msk.bf16.gmra.mrb[28].mxu1 %vm261_vm0, %v1231_v34  ;;  %v716_v34 = vld [vmem:[%s1596_s2 + $0x28] sm:$0xff] }
  0xdf   :  { %v1128_v35 = vpop.f32.mrb[0].mxu0  ;;  %v1160_v36 = vpop.f32.mrb[0].mxu1 }
  0xe0   :  { %v681_v37 = vmax.f32 %v1160_v36, 0.0  ;;  %v392_v38 = vpop.f32.mrb[1].mxu0  ;;  %v520_v40 = vpop.f32.mrb[1].mxu1  ;;  %v649_v41 = vmax.f32 %v1128_v35, 0.0 }
  0xe1   :  { %v647_v43 = vmax.f32 %v392_v38, 0.0  ;;  %v679_v44 = vmax.f32 %v520_v40, 0.0  ;;  %v1129_v45 = vpop.f32.mrb[2].mxu0  ;;  %v1161_v46 = vpop.f32.mrb[2].mxu1 }
  0xe2   :  { %v894_v47 = vmul.f32 %v713_v42, %v681_v37  ;;  %v650_v48 = vmax.f32 %v1129_v45, 0.0  ;;  %v682_v49 = vmax.f32 %v1161_v46, 0.0  ;;  %v395_v50 = vpop.f32.mrb[3].mxu0  ;;  %v523_v52 = vpop.f32.mrb[3].mxu1  ;;  %v745_v58 = vmul.f32 %v713_v42, %v649_v41  ;;  %v718_v37 = vld [vmem:[%s1596_s2 + $0x38] sm:$0xff] }
  0xe3   :  { %v743_v53 = vmul.f32 %v711_v39, %v647_v43  ;;  %v892_v54 = vmul.f32 %v711_v39, %v679_v44  ;;  %v648_v56 = vmax.f32 %v395_v50, 0.0  ;;  %v680_v57 = vmax.f32 %v523_v52, 0.0  ;;  %v721_v52 = vld [vmem:[%s1596_s2 + $0x50] sm:$0xff] }
  0xe4   :  { %v927_v62 = vsel %vm775_vm1, %v894_v47, 0.0  ;;  %v746_v63 = vmul.f32 %v714_v55, %v650_v48  ;;  %v895_v1 = vmul.f32 %v714_v55, %v682_v49  ;;  %v779_v12 = vsel %vm775_vm1, %v745_v58, 0.0  ;;  %v719_v48 = vld [vmem:[%s1596_s2 + $0x40] sm:$0xff] }
  0xe5   :  { %v924_v59 = vsel %vm775_vm1, %v892_v54, 0.0  ;;  %v744_v60 = vmul.f32 %v712_v51, %v648_v56  ;;  %v893_v61 = vmul.f32 %v712_v51, %v680_v57  ;;  %v776_v0 = vsel %vm775_vm1, %v743_v53, 0.0 }
  0xe6   :  { %v781_v17 = vsel %vm775_vm1, %v746_v63, 0.0  ;;  %v929_v22 = vsel %vm775_vm1, %v895_v1, 0.0 }
  0xe7   :  { %v777_v2 = vsel %vm775_vm1, %v744_v60, 0.0  ;;  %v925_v3 = vsel %vm775_vm1, %v893_v61, 0.0  ;;  %v1132_v4 = vpop.f32.mrb[4].mxu0  ;;  %v1164_v5 = vpop.f32.mrb[4].mxu1 }
  0xe8   :  { %v778_v6 = vadd.f32 %v777_v2, %v776_v0  ;;  %v926_v7 = vadd.f32 %v925_v3, %v924_v59  ;;  %v685_v8 = vmax.f32 %v1164_v5, 0.0  ;;  %v408_v9 = vpop.f32.mrb[5].mxu0  ;;  %v536_v11 = vpop.f32.mrb[5].mxu1  ;;  %v653_v23 = vmax.f32 %v1132_v4, 0.0 }
  0xe9   :  { %v651_v13 = vmax.f32 %v408_v9, 0.0  ;;  %v683_v14 = vmax.f32 %v536_v11, 0.0  ;;  %v1133_v15 = vpop.f32.mrb[6].mxu0  ;;  %v1165_v16 = vpop.f32.mrb[6].mxu1  ;;  %v720_v11 = vld [vmem:[%s1596_s2 + $0x48] sm:$0xff] }
  0xea   :  { %v780_v18 = vadd.f32 %v779_v12, %v778_v6  ;;  %v928_v19 = vadd.f32 %v927_v62, %v926_v7  ;;  %v411_v20 = vpop.f32.mrb[7].mxu0  ;;  %v539_v21 = vpop.f32.mrb[7].mxu1  ;;  %v898_v27 = vmul.f32 %v717_v24, %v685_v8  ;;  %v654_v32 = vmax.f32 %v1133_v15, 0.0 }
  0xeb   :  { %v747_v25 = vmul.f32 %v715_v10, %v651_v13  ;;  %v896_v26 = vmul.f32 %v715_v10, %v683_v14  ;;  %v686_v33 = vmax.f32 %v1165_v16, 0.0  ;;  %v652_v38 = vmax.f32 %v411_v20, 0.0  ;;  %v722_v10 = vld [vmem:[%s1596_s2 + $0x58] sm:$0xff] }
  0xec   :  { %v782_v28 = vadd.f32 %v781_v17, %v780_v18  ;;  %v930_v29 = vadd.f32 %v929_v22, %v928_v19  ;;  %v684_v39 = vmax.f32 %v539_v21, 0.0  ;;  %v749_v40 = vmul.f32 %v717_v24, %v653_v23 }
  0xed   :  { %v783_v30 = vsel %vm775_vm1, %v747_v25, 0.0  ;;  %v931_v31 = vsel %vm775_vm1, %v896_v26, 0.0  ;;  %v935_v43 = vsel %vm775_vm1, %v898_v27, 0.0  ;;  %v748_v44 = vmul.f32 %v716_v34, %v652_v38 }
  0xee   :  { %v784_v35 = vadd.f32 %v783_v30, %v782_v28  ;;  %v932_v36 = vadd.f32 %v931_v31, %v930_v29  ;;  %v897_v45 = vmul.f32 %v716_v34, %v684_v39  ;;  %v750_v50 = vmul.f32 %v718_v37, %v654_v32  ;;  %v723_v32 = vld [vmem:[%s1596_s2 + $0x60] sm:$0xff] }
  0xef   :  { %v1136_v41 = vpop.f32.mrb[8].mxu0  ;;  %v1168_v42 = vpop.f32.mrb[8].mxu1  ;;  %v899_v51 = vmul.f32 %v718_v37, %v686_v33  ;;  %v785_v57 = vsel %vm775_vm1, %v748_v44, 0.0  ;;  %v787_v3 = vsel %vm775_vm1, %v749_v40, 0.0  ;;  %v725_v44 = vld [vmem:[%s1596_s2 + $0x70] sm:$0xff] }
  0xf0   :  { %v689_v46 = vmax.f32 %v1168_v42, 0.0  ;;  %v424_v47 = vpop.f32.mrb[9].mxu0  ;;  %v552_v49 = vpop.f32.mrb[9].mxu1  ;;  %v933_v58 = vsel %vm775_vm1, %v897_v45, 0.0  ;;  %v657_v59 = vmax.f32 %v1136_v41, 0.0  ;;  %v786_v63 = vadd.f32 %v785_v57, %v784_v35 }
  0xf1   :  { %v655_v53 = vmax.f32 %v424_v47, 0.0  ;;  %v687_v54 = vmax.f32 %v552_v49, 0.0  ;;  %v1137_v55 = vpop.f32.mrb[10].mxu0  ;;  %v1169_v56 = vpop.f32.mrb[10].mxu1  ;;  %v934_v0 = vadd.f32 %v933_v58, %v932_v36  ;;  %v789_v6 = vsel %vm775_vm1, %v750_v50, 0.0  ;;  %v724_v58 = vld [vmem:[%s1596_s2 + $0x68] sm:$0xff] }
  0xf2   :  { %v902_v60 = vmul.f32 %v721_v52, %v689_v46  ;;  %v427_v61 = vpop.f32.mrb[11].mxu0  ;;  %v555_v62 = vpop.f32.mrb[11].mxu1  ;;  %v658_v4 = vmax.f32 %v1137_v55, 0.0  ;;  %v690_v5 = vmax.f32 %v1169_v56, 0.0  ;;  %v937_v7 = vsel %vm775_vm1, %v899_v51, 0.0 }
  0xf3   :  { %v751_v1 = vmul.f32 %v719_v48, %v655_v53  ;;  %v900_v2 = vmul.f32 %v719_v48, %v687_v54  ;;  %v788_v8 = vadd.f32 %v787_v3, %v786_v63  ;;  %v936_v9 = vadd.f32 %v935_v43, %v934_v0  ;;  %v726_v53 = vld [vmem:[%s1596_s2 + $0x78] sm:$0xff] }
  0xf4   :  { %v656_v14 = vmax.f32 %v427_v61, 0.0  ;;  %v688_v15 = vmax.f32 %v555_v62, 0.0  ;;  %v753_v16 = vmul.f32 %v721_v52, %v657_v59  ;;  %v943_v17 = vsel %vm775_vm1, %v902_v60, 0.0 }
  0xf5   :  { %v791_v12 = vsel %vm775_vm1, %v751_v1, 0.0  ;;  %v939_v13 = vsel %vm775_vm1, %v900_v2, 0.0  ;;  %v790_v18 = vadd.f32 %v789_v6, %v788_v8  ;;  %v938_v19 = vadd.f32 %v937_v7, %v936_v9 }
  0xf6   :  { %v754_v22 = vmul.f32 %v722_v10, %v658_v4  ;;  %v903_v23 = vmul.f32 %v722_v10, %v690_v5  ;;  %v752_v24 = vmul.f32 %v720_v11, %v656_v14  ;;  %v901_v25 = vmul.f32 %v720_v11, %v688_v15  ;;  %v729_v11 = vld [vmem:[%s1596_s2 + $0x90] sm:$0xff] }
  0xf7   :  { %v1140_v20 = vpop.f32.mrb[12].mxu0  ;;  %v1172_v21 = vpop.f32.mrb[12].mxu1  ;;  %v792_v28 = vadd.f32 %v791_v12, %v790_v18  ;;  %v940_v29 = vadd.f32 %v939_v13, %v938_v19  ;;  %v795_v41 = vsel %vm775_vm1, %v753_v16, 0.0  ;;  %v727_v12 = vld [vmem:[%s1596_s2 + $0x80] sm:$0xff] }
  0xf8   :  { %v440_v26 = vpop.f32.mrb[13].mxu0  ;;  %v568_v27 = vpop.f32.mrb[13].mxu1  ;;  %v661_v30 = vmax.f32 %v1140_v20, 0.0  ;;  %v693_v31 = vmax.f32 %v1172_v21, 0.0  ;;  %v793_v35 = vsel %vm775_vm1, %v752_v24, 0.0  ;;  %v941_v36 = vsel %vm775_vm1, %v901_v25, 0.0 }
  0xf9   :  { %v1141_v33 = vpop.f32.mrb[14].mxu0  ;;  %v1173_v34 = vpop.f32.mrb[14].mxu1  ;;  %v659_v37 = vmax.f32 %v440_v26, 0.0  ;;  %v691_v38 = vmax.f32 %v568_v27, 0.0  ;;  %v794_v42 = vadd.f32 %v793_v35, %v792_v28  ;;  %v942_v43 = vadd.f32 %v941_v36, %v940_v29  ;;  %v730_v29 = vld [vmem:[%s1596_s2 + $0x98] sm:$0xff] }
  0xfa   :  { %v443_v39 = vpop.f32.mrb[15].mxu0  ;;  %v571_v40 = vpop.f32.mrb[15].mxu1  ;;  %v662_v47 = vmax.f32 %v1141_v33, 0.0  ;;  %v694_v48 = vmax.f32 %v1173_v34, 0.0  ;;  %v797_v49 = vsel %vm775_vm1, %v754_v22, 0.0  ;;  %v945_v50 = vsel %vm775_vm1, %v903_v23, 0.0 }
  0xfb   :  { %v755_v45 = vmul.f32 %v723_v32, %v659_v37  ;;  %v904_v46 = vmul.f32 %v723_v32, %v691_v38  ;;  %v796_v51 = vadd.f32 %v795_v41, %v794_v42  ;;  %v944_v52 = vadd.f32 %v943_v17, %v942_v43  ;;  %v728_v34 = vld [vmem:[%s1596_s2 + $0x88] sm:$0xff] }
  0xfc   :  { %v757_v54 = vmul.f32 %v725_v44, %v661_v30  ;;  %v906_v55 = vmul.f32 %v725_v44, %v693_v31  ;;  %v660_v61 = vmax.f32 %v443_v39, 0.0  ;;  %v692_v62 = vmax.f32 %v571_v40, 0.0 }
  0xfd   :  { %v799_v56 = vsel %vm775_vm1, %v755_v45, 0.0  ;;  %v947_v57 = vsel %vm775_vm1, %v904_v46, 0.0  ;;  %v798_v59 = vadd.f32 %v797_v49, %v796_v51  ;;  %v946_v60 = vadd.f32 %v945_v50, %v944_v52  ;;  %v731_v50 = vld [vmem:[%s1596_s2 + $0xa0] sm:$0xff] }
  0xfe   :  { %v758_v1 = vmul.f32 %v726_v53, %v662_v47  ;;  %v907_v2 = vmul.f32 %v726_v53, %v694_v48  ;;  %v756_v9 = vmul.f32 %v724_v58, %v660_v61  ;;  %v905_v10 = vmul.f32 %v724_v58, %v692_v62 }
  0xff   :  { %v1144_v63 = vpop.f32.mrb[16].mxu0  ;;  %v1176_v0 = vpop.f32.mrb[16].mxu1  ;;  %v800_v7 = vadd.f32 %v799_v56, %v798_v59  ;;  %v948_v8 = vadd.f32 %v947_v57, %v946_v60  ;;  %v803_v15 = vsel %vm775_vm1, %v757_v54, 0.0  ;;  %v951_v16 = vsel %vm775_vm1, %v906_v55, 0.0 }
 0x100   :  { %v665_v3 = vmax.f32 %v1144_v63, 0.0  ;;  %v697_v4 = vmax.f32 %v1176_v0, 0.0  ;;  %v456_v5 = vpop.f32.mrb[17].mxu0  ;;  %v584_v6 = vpop.f32.mrb[17].mxu1  ;;  %v801_v21 = vsel %vm775_vm1, %v756_v9, 0.0  ;;  %v949_v22 = vsel %vm775_vm1, %v905_v10, 0.0 }
 0x101   :  { %v1145_v13 = vpop.f32.mrb[18].mxu0  ;;  %v1177_v14 = vpop.f32.mrb[18].mxu1  ;;  %v663_v17 = vmax.f32 %v456_v5, 0.0  ;;  %v695_v18 = vmax.f32 %v584_v6, 0.0  ;;  %v805_v25 = vsel %vm775_vm1, %v758_v1, 0.0  ;;  %v953_v26 = vsel %vm775_vm1, %v907_v2, 0.0 }
 0x102   :  { %v459_v19 = vpop.f32.mrb[19].mxu0  ;;  %v587_v20 = vpop.f32.mrb[19].mxu1  ;;  %v666_v23 = vmax.f32 %v1145_v13, 0.0  ;;  %v698_v24 = vmax.f32 %v1177_v14, 0.0  ;;  %v802_v27 = vadd.f32 %v801_v21, %v800_v7  ;;  %v950_v28 = vadd.f32 %v949_v22, %v948_v8  ;;  %v733_v1 = vld [vmem:[%s1596_s2 + $0xb0] sm:$0xff] }
 0x103   :  { %v761_v30 = vmul.f32 %v729_v11, %v665_v3  ;;  %v910_v31 = vmul.f32 %v729_v11, %v697_v4  ;;  %v759_v32 = vmul.f32 %v727_v12, %v663_v17  ;;  %v908_v33 = vmul.f32 %v727_v12, %v695_v18  ;;  %v734_v11 = vld [vmem:[%s1596_s2 + $0xb8] sm:$0xff] }
 0x104   :  { %v804_v35 = vadd.f32 %v803_v15, %v802_v27  ;;  %v952_v36 = vadd.f32 %v951_v16, %v950_v28  ;;  %v664_v37 = vmax.f32 %v459_v19, 0.0  ;;  %v696_v38 = vmax.f32 %v587_v20, 0.0  ;;  %v732_v16 = vld [vmem:[%s1596_s2 + $0xa8] sm:$0xff] }
 0x105   :  { %v807_v39 = vsel %vm775_vm1, %v759_v32, 0.0  ;;  %v955_v40 = vsel %vm775_vm1, %v908_v33, 0.0  ;;  %v762_v41 = vmul.f32 %v730_v29, %v666_v23  ;;  %v911_v42 = vmul.f32 %v730_v29, %v698_v24  ;;  %v735_v33 = vld [vmem:[%s1596_s2 + $0xc0] sm:$0xff] }
 0x106   :  { %v806_v45 = vadd.f32 %v805_v25, %v804_v35  ;;  %v954_v46 = vadd.f32 %v953_v26, %v952_v36  ;;  %v760_v47 = vmul.f32 %v728_v34, %v664_v37  ;;  %v909_v48 = vmul.f32 %v728_v34, %v696_v38 }
 0x107   :  { %v1148_v43 = vpop.f32.mrb[20].mxu0  ;;  %v1180_v44 = vpop.f32.mrb[20].mxu1  ;;  %v959_v0 = vsel %vm775_vm1, %v910_v31, 0.0  ;;  %v811_v8 = vsel %vm775_vm1, %v761_v30, 0.0  ;;  %v813_v9 = vsel %vm775_vm1, %v762_v41, 0.0  ;;  %v961_v10 = vsel %vm775_vm1, %v911_v42, 0.0 }
 0x108   :  { %v472_v49 = vpop.f32.mrb[21].mxu0  ;;  %v600_v51 = vpop.f32.mrb[21].mxu1  ;;  %v669_v52 = vmax.f32 %v1148_v43, 0.0  ;;  %v701_v53 = vmax.f32 %v1180_v44, 0.0  ;;  %v808_v58 = vadd.f32 %v807_v39, %v806_v45  ;;  %v956_v59 = vadd.f32 %v955_v40, %v954_v46  ;;  %v737_v46 = vld [vmem:[%s1596_s2 + $0xd0] sm:$0xff] }
 0x109   :  { %v667_v54 = vmax.f32 %v472_v49, 0.0  ;;  %v699_v55 = vmax.f32 %v600_v51, 0.0  ;;  %v1149_v56 = vpop.f32.mrb[22].mxu0  ;;  %v1181_v57 = vpop.f32.mrb[22].mxu1  ;;  %v809_v60 = vsel %vm775_vm1, %v760_v47, 0.0  ;;  %v957_v61 = vsel %vm775_vm1, %v909_v48, 0.0 }
 0x10a   :  { %v475_v62 = vpop.f32.mrb[23].mxu0  ;;  %v603_v63 = vpop.f32.mrb[23].mxu1  ;;  %v810_v4 = vadd.f32 %v809_v60, %v808_v58  ;;  %v958_v5 = vadd.f32 %v957_v61, %v956_v59  ;;  %v670_v6 = vmax.f32 %v1149_v56, 0.0  ;;  %v702_v7 = vmax.f32 %v1181_v57, 0.0  ;;  %v736_v60 = vld [vmem:[%s1596_s2 + $0xc8] sm:$0xff] }
 0x10b   :  { %v763_v2 = vmul.f32 %v731_v50, %v667_v54  ;;  %v912_v3 = vmul.f32 %v731_v50, %v699_v55  ;;  %v765_v14 = vmul.f32 %v733_v1, %v669_v52  ;;  %v914_v15 = vmul.f32 %v733_v1, %v701_v53  ;;  %v738_v54 = vld [vmem:[%s1596_s2 + $0xd8] sm:$0xff] }
 0x10c   :  { %v812_v12 = vadd.f32 %v811_v8, %v810_v4  ;;  %v960_v13 = vadd.f32 %v959_v0, %v958_v5  ;;  %v668_v19 = vmax.f32 %v475_v62, 0.0  ;;  %v700_v20 = vmax.f32 %v603_v63, 0.0 }
 0x10d   :  { %v815_v17 = vsel %vm775_vm1, %v763_v2, 0.0  ;;  %v963_v18 = vsel %vm775_vm1, %v912_v3, 0.0  ;;  %v766_v25 = vmul.f32 %v734_v11, %v670_v6  ;;  %v915_v26 = vmul.f32 %v734_v11, %v702_v7 }
 0x10e   :  { %v814_v23 = vadd.f32 %v813_v9, %v812_v12  ;;  %v962_v24 = vadd.f32 %v961_v10, %v960_v13  ;;  %v764_v29 = vmul.f32 %v732_v16, %v668_v19  ;;  %v913_v30 = vmul.f32 %v732_v16, %v700_v20 }
 0x10f   :  { %v1152_v21 = vpop.f32.mrb[24].mxu0  ;;  %v1184_v22 = vpop.f32.mrb[24].mxu1  ;;  %v819_v42 = vsel %vm775_vm1, %v765_v14, 0.0  ;;  %v967_v43 = vsel %vm775_vm1, %v914_v15, 0.0  ;;  %v821_v51 = vsel %vm775_vm1, %v766_v25, 0.0  ;;  %v969_v52 = vsel %vm775_vm1, %v915_v26, 0.0 }
 0x110   :  { %v488_v27 = vpop.f32.mrb[25].mxu0  ;;  %v616_v28 = vpop.f32.mrb[25].mxu1  ;;  %v673_v31 = vmax.f32 %v1152_v21, 0.0  ;;  %v705_v32 = vmax.f32 %v1184_v22, 0.0  ;;  %v816_v36 = vadd.f32 %v815_v17, %v814_v23  ;;  %v964_v37 = vadd.f32 %v963_v18, %v962_v24  ;;  %v739_v18 = vld [vmem:[%s1596_s2 + $0xe0] sm:$0xff] }
 0x111   :  { %v1153_v34 = vpop.f32.mrb[26].mxu0  ;;  %v1185_v35 = vpop.f32.mrb[26].mxu1  ;;  %v671_v38 = vmax.f32 %v488_v27, 0.0  ;;  %v703_v39 = vmax.f32 %v616_v28, 0.0  ;;  %v817_v44 = vsel %vm775_vm1, %v764_v29, 0.0  ;;  %v965_v45 = vsel %vm775_vm1, %v913_v30, 0.0 }
 0x112   :  { %v491_v40 = vpop.f32.mrb[27].mxu0  ;;  %v619_v41 = vpop.f32.mrb[27].mxu1  ;;  %v818_v47 = vadd.f32 %v817_v44, %v816_v36  ;;  %v966_v48 = vadd.f32 %v965_v45, %v964_v37  ;;  %v674_v53 = vmax.f32 %v1153_v34, 0.0  ;;  %v706_v55 = vmax.f32 %v1185_v35, 0.0  ;;  %v741_v29 = vld [vmem:[%s1596_s2 + $0xf0] sm:$0xff]  ;;  %v740_v34 = vld [vmem:[%s1596_s2 + $0xe8] sm:$0xff] }
 0x113   :  { %v767_v49 = vmul.f32 %v735_v33, %v671_v38  ;;  %v916_v50 = vmul.f32 %v735_v33, %v703_v39  ;;  %v769_v58 = vmul.f32 %v737_v46, %v673_v31  ;;  %v918_v59 = vmul.f32 %v737_v46, %v705_v32  ;;  %v742_v45 = vld [vmem:[%s1596_s2 + $0xf8] sm:$0xff]  ;;  %s1257_s2 = smov [#allocation3]  }
 0x114   :  { %v820_v56 = vadd.f32 %v819_v42, %v818_v47  ;;  %v968_v57 = vadd.f32 %v967_v43, %v966_v48  ;;  %v672_v63 = vmax.f32 %v491_v40, 0.0  ;;  %v704_v0 = vmax.f32 %v619_v41, 0.0  ;;  %s1014_s6 = sshll.u32 %s1257_s2, 4  ;;  %s1015_s6 = int_to_ptr.vmem [resolvable:$true] %s1014_s6 }
 0x115   :  { %v823_v61 = vsel %vm775_vm1, %v767_v49, 0.0  ;;  %v971_v62 = vsel %vm775_vm1, %v916_v50, 0.0  ;;  %v770_v5 = vmul.f32 %v738_v54, %v674_v53  ;;  %v919_v8 = vmul.f32 %v738_v54, %v706_v55  ;;  %s1232_s7 = scalar_lea.vmem %s1015_s6, 32  ;;  %p1237_p1 = scmp.lt.s32.totalorder %s1015_s6, %s1015_s6 }
 0x116   :  { %v822_v3 = vadd.f32 %v821_v51, %v820_v56  ;;  %v970_v4 = vadd.f32 %v969_v52, %v968_v57  ;;  %v768_v9 = vmul.f32 %v736_v60, %v672_v63  ;;  %v917_v10 = vmul.f32 %v736_v60, %v704_v0  ;;  %p1233_p0 = scmp.ne.s32.totalorder %s1015_s6, %s1232_s7  ;;  %p1238_p2 = scmp.lt.s32.totalorder %s1232_s7, %s1232_s7 }
 0x117   :  { %v1156_v1 = vpop.f32.mrb[28].mxu0  ;;  %v1188_v2 = vpop.f32.mrb[28].mxu1  ;;  %v827_v14 = vsel %vm775_vm1, %v769_v58, 0.0  ;;  %v975_v15 = vsel %vm775_vm1, %v918_v59, 0.0  ;;  %v829_v25 = vsel %vm775_vm1, %v770_v5, 0.0  ;;  %v977_v30 = vsel %vm775_vm1, %v919_v8, 0.0 }
 0x118   :  { %v504_v6 = vpop.f32.mrb[29].mxu0  ;;  %v632_v7 = vpop.f32.mrb[29].mxu1  ;;  %v709_v11 = vmax.f32 %v1188_v2, 0.0  ;;  %v824_v16 = vadd.f32 %v823_v61, %v822_v3  ;;  %v972_v17 = vadd.f32 %v971_v62, %v970_v4  ;;  %v825_v21 = vsel %vm775_vm1, %v768_v9, 0.0  ;;  %p1239_p3 = por %p1238_p2, %p1237_p1 }
 0x119   :  { %v1157_v12 = vpop.f32.mrb[30].mxu0  ;;  %v1189_v13 = vpop.f32.mrb[30].mxu1  ;;  %v973_v22 = vsel %vm775_vm1, %v917_v10, 0.0  ;;  %v675_v23 = vmax.f32 %v504_v6, 0.0  ;;  %v707_v24 = vmax.f32 %v632_v7, 0.0  ;;  %v677_v28 = vmax.f32 %v1156_v1, 0.0 }
 0x11a   :  { %v507_v19 = vpop.f32.mrb[31].mxu0  ;;  %v635_v20 = vpop.f32.mrb[31].mxu1  ;;  %v826_v26 = vadd.f32 %v825_v21, %v824_v16  ;;  %v974_v27 = vadd.f32 %v973_v22, %v972_v17  ;;  %v922_v31 = vmul.f32 %v741_v29, %v709_v11  ;;  %v678_v41 = vmax.f32 %v1157_v12, 0.0  ;;  %v848_v16 = vld [vmem:[#allocation2] sm:$0x1]  ;;  %p1240_p4 = pnand %p1239_p3, %p1233_p0 }
 0x11b   :  { %v771_v32 = vmul.f32 %v739_v18, %v675_v23  ;;  %v920_v33 = vmul.f32 %v739_v18, %v707_v24  ;;  %v676_v37 = vmax.f32 %v507_v19, 0.0  ;;  %v708_v38 = vmax.f32 %v635_v20, 0.0  ;;  %v996_v19 = vld [vmem:[#allocation2] sm:$0x1] }
 0x11c   :  { %v828_v35 = vadd.f32 %v827_v14, %v826_v26  ;;  %v976_v36 = vadd.f32 %v975_v15, %v974_v27  ;;  %v710_v42 = vmax.f32 %v1189_v13, 0.0  ;;  %v773_v48 = vmul.f32 %v741_v29, %v677_v28 }
 0x11d   :  { %v831_v39 = vsel %vm775_vm1, %v771_v32, 0.0  ;;  %v979_v40 = vsel %vm775_vm1, %v920_v33, 0.0  ;;  %v772_v46 = vmul.f32 %v740_v34, %v676_v37  ;;  %v921_v47 = vmul.f32 %v740_v34, %v708_v38 }
 0x11e   :  { %v830_v43 = vadd.f32 %v829_v25, %v828_v35  ;;  %v978_v44 = vadd.f32 %v977_v30, %v976_v36  ;;  %v983_v53 = vsel %vm775_vm1, %v922_v31, 0.0  ;;  %v774_v54 = vmul.f32 %v742_v45, %v678_v41 }
 0x11f   :  { %v833_v51 = vsel %vm775_vm1, %v772_v46, 0.0  ;;  %v981_v52 = vsel %vm775_vm1, %v921_v47, 0.0  ;;  %v923_v55 = vmul.f32 %v742_v45, %v710_v42  ;;  %v835_v58 = vsel %vm775_vm1, %v773_v48, 0.0 }
 0x120   :  { %v832_v49 = vadd.f32 %v831_v39, %v830_v43  ;;  %v980_v50 = vadd.f32 %v979_v40, %v978_v44  ;;  %v837_v61 = vsel %vm775_vm1, %v774_v54, 0.0  ;;  %v1256_v15 = vmov 0  }
 0x121   :  { %v985_v62 = vsel %vm775_vm1, %v923_v55, 0.0  ;;  %1196 = vset.pattern.permute.xlu1 %v1256_v15  ;;  %1197 = vset.pattern.permute.xlu0 %v1256_v15  ;;  %v855_v22 = vlaneseq }
 0x122   :  { %v834_v56 = vadd.f32 %v833_v51, %v832_v49  ;;  %v982_v57 = vadd.f32 %v981_v52, %v980_v50 }
 0x123   :  { %v856_v23 = vshrl.u32 %v855_v22, 7 }
 0x124   :  { %v836_v59 = vadd.f32 %v835_v58, %v834_v56  ;;  %v984_v60 = vadd.f32 %v983_v53, %v982_v57 }
 0x125   :  { %v857_v24 = vsub.s32 0, %v856_v23 }
 0x126   :  { %v838_v63 = vadd.f32 %v837_v61, %v836_v59  ;;  %v986_v0 = vadd.f32 %v985_v62, %v984_v60 }
 0x128   :  { %v839_v1 = vrot.slane %v838_v63, 4  ;;  %v987_v2 = vrot.slane %v986_v0, 4 }
 0x12a   :  { %v840_v3 = vadd.f32 %v839_v1, %v838_v63  ;;  %v988_v4 = vadd.f32 %v987_v2, %v986_v0 }
 0x12c   :  { %v841_v5 = vrot.slane %v840_v3, 2  ;;  %v989_v6 = vrot.slane %v988_v4, 2 }
 0x12e   :  { %v842_v7 = vadd.f32 %v841_v5, %v840_v3  ;;  %v990_v8 = vadd.f32 %v989_v6, %v988_v4 }
 0x130   :  { %v843_v9 = vrot.slane %v842_v7, 1  ;;  %v991_v10 = vrot.slane %v990_v8, 1 }
 0x132   :  { %v844_v11 = vadd.f32 %v843_v9, %v842_v7  ;;  %v992_v13 = vadd.f32 %v991_v10, %v990_v8 }
 0x134   :  { %v845_v12 = vsel %vm775_vm1, %v844_v11, 0.0  ;;  %v993_v14 = vsel %vm775_vm1, %v992_v13, 0.0 }
 0x135   :  { %846 = vadd.xlane.f32.xlu0 %v845_v12 }
 0x139   :  { %994 = vadd.xlane.f32.xlu0 %v993_v14 }
 0x1c2   :  { %v847_v17 = vpop.xlane.xlu0 %846 }
 0x1c3   :  { %v849_v18 = vadd.f32 %v848_v16, %v847_v17 }
 0x1c5   :  { %852 = vperm.xlu1 %1196, %v849_v18  }
 0x1c6   :  { %v995_v20 = vpop.xlane.xlu0 %994 }
 0x1c7   :  { %v997_v21 = vadd.f32 %v996_v19, %v995_v20 }
 0x1c9   :  { %1000 = vperm.xlu1 %1196, %v997_v21  }
 0x244   :  { %v853_v25 = vpop.permute.xlu1 %852 }
 0x245   :  { %v858_v26 = vrot.slane %v853_v25, %v857_v24 }
 0x247   :  { %859 = vst [vmem:[#allocation3] sm:$0x1] %v858_v26 }
 0x248   :  { %v1001_v27 = vpop.permute.xlu1 %1000 }
 0x249   :  { %v1006_v28 = vrot.slane %v1001_v27, %v857_v24 }
 0x24b   :  { %1007 = vst [vmem:[#allocation3 + $0x1] sm:$0x1] %v1006_v28 }
 0x24c   :  { %1243 = shalt.err (!%p1240_p4)
}
 0x24d   :  { %s1244_s10 = scalar_lea.hbm %s1598_s4, 32 }
 0x24e   :  { %p1245_p5 = scmp.ne.s32.totalorder %s1598_s4, %s1244_s10  ;;  %p1248_p6 = scmp.lt.u32.totalorder %s1244_s10, %s1598_s4 }
 0x250   :  { %p1250_p7 = pnand %p1248_p6, %p1245_p5 }
 0x252   :  { %1253 = shalt.err (!%p1250_p7)
}
 0x253   :  { %1017 = dma.vmem_to_hbm [thread:$0]  %s1015_s6, 32, %s1598_s4, [#allocation4]  }
 0x254   :  { %1254 = dma.done.wait [#allocation4], 32  }
 0x255   :  { %1255 = vsyncadd [#allocation4], 4294967264 }
 0x256   :  { %1021 = vsyncpa [#allocation4], 1 }

</bundles_post_ra>
